<compile_context>
chip_gen: v5e
topology: v5e:2x2
jax: 0.10.0
libtpu: 0.0.40
codegen_flags: <defaults>
</compile_context>

<pallas_src>
import jax
import jax.numpy as jnp
from jax.experimental import pallas as pl
from jax.experimental.pallas import tpu as pltpu

LANE = 128


def _round_up(x, m):
    return ((x + m - 1) // m) * m


def conditional_gnn_kernel(nodes_ref, dom_ref, w1_ref, w2_ref, out_ref):
    # nodes_ref : (bm, N, Dn)  bf16  node features for this batch block
    # dom_ref   : (bm, 1)      i32   domain id per graph
    # w1_ref    : (Dn, Cp)     bf16  fused graph-path weight ((Wb @ Wg)/N)
    # w2_ref    : (NDp, Cp)    bf16  fused domain table (class_emb @ Wd + biases)
    # out_ref   : (bm, Cp)     f32   lane-dense logits (Cp = 128-padded num_classes)
    bm = dom_ref.shape[0]
    nd = w2_ref.shape[0]

    # sum-pool over the node axis in f32 (the 1/N of the mean is folded into W1),
    # back to bf16 for the MXU.
    pooled = jnp.sum(nodes_ref[...].astype(jnp.float32), axis=1)       # (bm, Dn)
    pooled = pooled.astype(jnp.bfloat16)

    # in-kernel "index_select": one-hot(domains) @ W2 (tiny MXU pass, no XLA gather)
    dom = dom_ref[...]                                                  # (bm, 1) int32
    onehot = (jax.lax.broadcasted_iota(jnp.int32, (bm, nd), 1) == dom
              ).astype(jnp.bfloat16)                                    # (bm, nd)

    out = (jnp.dot(pooled, w1_ref[...], preferred_element_type=jnp.float32)
           + jnp.dot(onehot, w2_ref[...], preferred_element_type=jnp.float32))
    out_ref[...] = out.astype(out_ref.dtype)


def prepare_params(params, num_nodes):
    """One-time host-side weight fusion.

    params = (class_emb, w_backend, b_backend, w_pred, b_pred)
      class_emb : (num_domain, emb_dim)
      w_backend : (Dn, backend_dim)        b_backend : (backend_dim,)
      w_pred    : (num_classes, backend_dim + emb_dim)   (PyTorch Linear layout)
      b_pred    : (num_classes,)
    Returns (w1, w2, num_classes) ready for the fused kernel.
    """
    class_emb, wb, bb, wp, bp = params
    dn, db = wb.shape
    c = wp.shape[0]
    num_domain = class_emb.shape[0]

    wg = wp[:, :db].T                                   # (Db, C)  predictor, graph half
    wd = wp[:, db:].T                                   # (De, C)  predictor, domain half

    # graph path: mean-pool (1/N) + backend Linear + predictor folded into one weight
    w1 = (wb @ wg) / float(num_nodes)                   # (Dn, C)

    # domain path: class_emb @ Wd with both biases folded in (one-hot rows sum to 1)
    bias = bb @ wg + bp                                 # (C,)
    w2 = class_emb @ wd + bias[None, :]                 # (num_domain, C)

    # lane-dense / sublane-aligned padding
    cp = _round_up(c, LANE)
    ndp = _round_up(num_domain, 8)
    w1 = jnp.pad(w1, ((0, 0), (0, cp - c)))
    w2 = jnp.pad(w2, ((0, ndp - num_domain), (0, cp - c)))
    return w1.astype(jnp.bfloat16), w2.astype(jnp.bfloat16), c


def _choose_bm(batch):
    bp = _round_up(max(batch, 1), 8)
    if bp <= 8:
        # TODO(synk): at B<=8 the kernel is pure launch/DMA overhead; batch several
        #             forward calls together at the call site to amortize it.
        return bp
    # >= 2 grid steps so v7x can shard the 'parallel' batch axis over both
    # TensorCores; cap tiles at 512 rows (mem-bound ~85% HBM roofline on v5e/v6e).
    return min(512, _round_up(pl.cdiv(bp, 2), 8))


def conditional_gnn_forward(prepared, node_feat, domains):
    """Fused ConditionalGnn forward.  node_feat: (B, N, Dn), domains: (B,) int."""
    w1, w2, num_classes = prepared
    B, N, Dn = node_feat.shape
    Cp = w1.shape[1]
    NDp = w2.shape[0]

    bm = _choose_bm(B)
    Bp = _round_up(B, bm)

    nodes = node_feat.astype(jnp.bfloat16)              # halve the dominant HBM stream
    dom2d = domains.astype(jnp.int32).reshape(B, 1)
    if Bp != B:
        # padded rows get domain 0 (so W2 row 0 incl. folded bias); they are
        # discarded by the out[:B] slice below -- keep that invariant.
        nodes = jnp.pad(nodes, ((0, Bp - B), (0, 0), (0, 0)))
        dom2d = jnp.pad(dom2d, ((0, Bp - B), (0, 0)))

    # VMEM estimate: double-buffered nodes/dom/out blocks + single-buffered weights.
    vmem_bytes = (2 * bm * N * Dn * 2 + 2 * bm * 4
                  + (Dn + NDp) * Cp * 2 + 2 * bm * Cp * 4)
    vmem_limit = int(min(max(4 * vmem_bytes, 1 << 20), 48 << 20))

    out = pl.pallas_call(
        conditional_gnn_kernel,
        out_shape=jax.ShapeDtypeStruct((Bp, Cp), jnp.float32),
        grid=(Bp // bm,),
        in_specs=[
            pl.BlockSpec((bm, N, Dn), lambda i: (i, 0, 0)),
            pl.BlockSpec((bm, 1), lambda i: (i, 0)),
            # constant index_map => weights stay resident; single-buffer them
            pl.BlockSpec((Dn, Cp), lambda i: (0, 0),
                         pipeline_mode=pl.Buffered(1)),
            pl.BlockSpec((NDp, Cp), lambda i: (0, 0),
                         pipeline_mode=pl.Buffered(1)),
        ],
        out_specs=pl.BlockSpec((bm, Cp), lambda i: (i, 0)),
        compiler_params=pltpu.CompilerParams(
            dimension_semantics=("parallel",),           # shard batch over v7x's 2 TCs
            vmem_limit_bytes=vmem_limit),
    )(nodes, dom2d, w1, w2)
    return out[:B, :num_classes]


def reference_forward(params, node_feat, domains):
    """Plain-JAX f32 reference mirroring the PyTorch forward (unfused)."""
    class_emb, wb, bb, wp, bp = params
    domain_feat = jnp.take(class_emb, domains, axis=0)
    graph_feat = jnp.mean(node_feat, axis=1) @ wb + bb
    feat = jnp.concatenate([graph_feat, domain_feat], axis=1)
    return feat @ wp.T + bp


if __name__ == "__main__":
    # small shapes consistent with the module
    B, N, Dn = 8, 6, 24          # graphs, nodes per graph, node feature dim
    emb_dim = 16                 # De
    backend_dim = 32             # Db
    num_domain = 5
    num_classes = 4              # C

    key = jax.random.PRNGKey(0)
    k1, k2, k3, k4, k5, k6, k7 = jax.random.split(key, 7)

    # deterministic parameter init (class_emb is torch.zeros in __init__, but small
    # randoms are used so the domain-gather path is exercised non-trivially)
    class_emb = 0.1 * jax.random.normal(k1, (num_domain, emb_dim), jnp.float32)
    w_backend = 0.1 * jax.random.normal(k2, (Dn, backend_dim), jnp.float32)
    b_backend = 0.1 * jax.random.normal(k3, (backend_dim,), jnp.float32)
    bound = 1.0 / float(jnp.sqrt(backend_dim + emb_dim))
    w_pred = jax.random.uniform(k4, (num_classes, backend_dim + emb_dim),
                                jnp.float32, -bound, bound)
    b_pred = jax.random.uniform(k5, (num_classes,), jnp.float32, -bound, bound)
    params = (class_emb, w_backend, b_backend, w_pred, b_pred)

    # deterministic inputs
    node_feat = jax.random.normal(k6, (B, N, Dn), jnp.float32)
    domains = jax.random.randint(k7, (B,), 0, num_domain, jnp.int32)

    # one-time weight fusion, then the fused forward
    prepared = prepare_params(params, N)
    out = conditional_gnn_forward(prepared, node_feat, domains)
    out = jax.block_until_ready(out)

    ref = reference_forward(params, node_feat, domains)
    assert out.shape == (B, num_classes)
    # bf16 matmul operands with f32 accumulation -> loosened tolerance vs f32 ref
    assert jnp.allclose(out, ref, atol=1e-2, rtol=1e-2), "mismatch vs reference"

    print("KERNEL_OK")
</pallas_src>

<mosaic_0001>
module attributes {stable_mosaic.version = 11 : i64} {
  func.func @conditional_gnn_kernel(%arg0: i32, %arg1: memref<8x6x24xbf16, #tpu.memory_space<vmem>>, %arg2: memref<8x1xi32, #tpu.memory_space<vmem>>, %arg3: memref<24x128xbf16, #tpu.memory_space<vmem>>, %arg4: memref<8x128xbf16, #tpu.memory_space<vmem>>, %arg5: memref<8x128xf32, #tpu.memory_space<vmem>>) attributes {dimension_semantics = [#tpu.dimension_semantics<parallel>], iteration_bounds = array<i64: 1>, scalar_prefetch = 0 : i64, scratch_operands = 0 : i64, tpu.core_type = #tpu.core_type<tc>, window_params = [{transform_indices = @transform_0, window_bounds = array<i64: 8, 6, 24>}, {transform_indices = @transform_1, window_bounds = array<i64: 8, 1>}, {pipeline_mode = #tpu.pipeline_mode<synchronous>, transform_indices = @transform_2, window_bounds = array<i64: 24, 128>}, {pipeline_mode = #tpu.pipeline_mode<synchronous>, transform_indices = @transform_3, window_bounds = array<i64: 8, 128>}, {transform_indices = @transform_4, window_bounds = array<i64: 8, 128>}]} {
    %c0 = arith.constant 0 : index
    %c0_0 = arith.constant 0 : index
    %c0_1 = arith.constant 0 : index
    %0 = vector.load %arg1[%c0, %c0_0, %c0_1] : memref<8x6x24xbf16, #tpu.memory_space<vmem>>, vector<8x6x24xbf16>
    %1 = arith.extf %0 : vector<8x6x24xbf16> to vector<8x6x24xf32>
    %cst = arith.constant dense<0.000000e+00> : vector<8x24xf32>
    %2 = vector.multi_reduction <add>, %1, %cst [1] : vector<8x6x24xf32> to vector<8x24xf32>
    %3 = arith.truncf %2 : vector<8x24xf32> to vector<8x24xbf16>
    %c0_2 = arith.constant 0 : index
    %c0_3 = arith.constant 0 : index
    %4 = vector.load %arg2[%c0_2, %c0_3] : memref<8x1xi32, #tpu.memory_space<vmem>>, vector<8x1xi32>
    %5 = tpu.iota {dimensions = array<i32: 1>} : vector<8x8xi32>
    %6 = vector.broadcast %4 : vector<8x1xi32> to vector<8x8xi32>
    %7 = arith.cmpi eq, %5, %6 : vector<8x8xi32>
    %8 = arith.extui %7 : vector<8x8xi1> to vector<8x8xi32>
    %9 = arith.sitofp %8 : vector<8x8xi32> to vector<8x8xf32>
    %10 = arith.truncf %9 : vector<8x8xf32> to vector<8x8xbf16>
    %c0_4 = arith.constant 0 : index
    %c0_5 = arith.constant 0 : index
    %11 = vector.load %arg3[%c0_4, %c0_5] : memref<24x128xbf16, #tpu.memory_space<vmem>>, vector<24x128xbf16>
    %cst_6 = arith.constant dense<0.000000e+00> : vector<8x128xf32>
    %12 = tpu.matmul %3, %11, %cst_6 {dimension_numbers = #tpu.dot_dimension_numbers<[1], [0], [0], [1], [0, 0, 1, 1], [], []>} : vector<8x24xbf16>, vector<24x128xbf16>, vector<8x128xf32> -> vector<8x128xf32>
    %c0_7 = arith.constant 0 : index
    %c0_8 = arith.constant 0 : index
    %13 = vector.load %arg4[%c0_7, %c0_8] : memref<8x128xbf16, #tpu.memory_space<vmem>>, vector<8x128xbf16>
    %cst_9 = arith.constant dense<0.000000e+00> : vector<8x128xf32>
    %14 = tpu.matmul %10, %13, %cst_9 {dimension_numbers = #tpu.dot_dimension_numbers<[1], [0], [0], [1], [0, 0, 1, 1], [], []>} : vector<8x8xbf16>, vector<8x128xbf16>, vector<8x128xf32> -> vector<8x128xf32>
    %15 = arith.addf %12, %14 : vector<8x128xf32>
    %c0_10 = arith.constant 0 : index
    %c0_11 = arith.constant 0 : index
    %16 = vector.load %arg5[%c0_10, %c0_11] : memref<8x128xf32, #tpu.memory_space<vmem>>, vector<8x128xf32>
    tpu.vector_store %arg5[%c0_10, %c0_11], %15 {strides = array<i32>} : memref<8x128xf32, #tpu.memory_space<vmem>>, vector<8x128xf32>,
    return
  }
  func.func @transform_0(%arg0: i32) -> (i32, i32, i32) {
    %c0_i32 = arith.constant 0 : i32
    %c0_i32_0 = arith.constant 0 : i32
    %c0_i32_1 = arith.constant 0 : i32
    return %arg0, %c0_i32, %c0_i32_0 : i32, i32, i32
  }
  func.func @transform_1(%arg0: i32) -> (i32, i32) {
    %c0_i32 = arith.constant 0 : i32
    %c0_i32_0 = arith.constant 0 : i32
    return %arg0, %c0_i32 : i32, i32
  }
  func.func @transform_2(%arg0: i32) -> (i32, i32) {
    %c0_i32 = arith.constant 0 : i32
    %c0_i32_0 = arith.constant 0 : i32
    %c0_i32_1 = arith.constant 0 : i32
    return %c0_i32, %c0_i32_0 : i32, i32
  }
  func.func @transform_3(%arg0: i32) -> (i32, i32) {
    %c0_i32 = arith.constant 0 : i32
    %c0_i32_0 = arith.constant 0 : i32
    %c0_i32_1 = arith.constant 0 : i32
    return %c0_i32, %c0_i32_0 : i32, i32
  }
  func.func @transform_4(%arg0: i32) -> (i32, i32) {
    %c0_i32 = arith.constant 0 : i32
    %c0_i32_0 = arith.constant 0 : i32
    return %arg0, %c0_i32 : i32, i32
  }
}

</mosaic_0001>

<bundles_post_ra>
// kernel: tpu_custom_call.1
= control target key start
LH: loop header
LB: loop body
LE: loop exit
PB: predicated region body
PF: predicated region fallthrough
CT: control target
= control target key end

     0   :  { %vm118_vm0 = vcmask 1043456   ;;  %v250_v2 = vmov 0   ;;  %s328_s0 = inlined_call_operand.vmem [shape: bf16[8,6,24], index: 0, kind: input, shape index: {}]   ;;  %s329_s1 = inlined_call_operand.vmem [shape: s32[8,1], index: 1, kind: input, shape index: {}]   ;;  %s330_s2 = inlined_call_operand.vmem [shape: bf16[24,128], index: 2, kind: input, shape index: {}]   ;;  %s331_s3 = inlined_call_operand.vmem [shape: bf16[8,128], index: 3, kind: input, shape index: {}]   ;;  %s332_s4 = inlined_call_operand.hbm [shape: f32[8,128], index: 4, kind: output, shape index: {}]  }
   0x1   :  { %v100_v0 = vld [vmem:[%s329_s1] sm:$0xff]  ;;  %v112_v1 = vld [vmem:[%s330_s2 + $0x8] sm:$0xf]  ;;  %223 = vset.pattern.permute.xlu0 %v250_v2  ;;  %v22_v7 = vld [vmem:[%s328_s0 + $0xc] sm:$0x7] }
   0x2   :  { %v171_v3 = vunpack.c.l.b16 %v112_v1  ;;  %v19_v4 = vld [vmem:[%s328_s0] sm:$0x7]  ;;  %v20_v5 = vld [vmem:[%s328_s0 + $0x4] sm:$0x7]  ;;  %v21_v6 = vld [vmem:[%s328_s0 + $0x8] sm:$0x7]  ;;  %104 = vperm.xlu0 %223, %v100_v0   ;;  %v30_v16 = vunpack.c.l.bf16 %v22_v7 }
   0x3   :  { %v23_v8 = vld [vmem:[%s328_s0 + $0x10] sm:$0x7]  ;;  %v24_v9 = vld [vmem:[%s328_s0 + $0x14] sm:$0x7]  ;;  %v27_v10 = vunpack.c.l.bf16 %v19_v4  ;;  %v28_v11 = vunpack.c.l.bf16 %v20_v5  ;;  %v29_v12 = vunpack.c.l.bf16 %v21_v6  ;;  %v25_v14 = vld [vmem:[%s328_s0 + $0x18] sm:$0x7] }
   0x4   :  { %v173_v13 = vpack.c.b16 %v171_v3, %v171_v3  ;;  %v26_v15 = vld [vmem:[%s328_s0 + $0x1c] sm:$0x7]  ;;  %v31_v17 = vunpack.c.l.bf16 %v23_v8  ;;  %v32_v18 = vunpack.c.l.bf16 %v24_v9 }
   0x5   :  { %9 = vsyncpa [#allocation3], 0  ;;  %v33_v19 = vunpack.c.l.bf16 %v25_v14  ;;  %v34_v20 = vunpack.c.l.bf16 %v26_v15  ;;  %vm35_vm1 = vcmask 193536   ;;  %v219_v25 = vld [vmem:[%s330_s2] sm:$0xff]  ;;  %vm151_vm2 = vcmask 1041409   ;;  %s252_s10 = smov [#allocation2]  }
   0x6   :  { %v180_v21 = vsel %vm118_vm0, %v173_v13, 0  ;;  %v36_v22 = vsel %vm35_vm1, %v27_v10, 0.0  ;;  %v43_v23 = vsel %vm35_vm1, %v28_v11, 0.0  ;;  %v50_v24 = vsel %vm35_vm1, %v29_v12, 0.0  ;;  %s201_s11 = sshll.u32 %s252_s10, 4  ;;  %s202_s11 = int_to_ptr.vmem [resolvable:$true] %s201_s11 }
   0x7   :  { %188 = vmatpush.bf16.msra.mxu1 %v180_v21  ;;  %v37_v26 = vrot.slane %v36_v22, 4  ;;  %v44_v27 = vrot.slane %v43_v23, 4  ;;  %v51_v28 = vrot.slane %v50_v24, 4  ;;  %v57_v29 = vsel %vm35_vm1, %v30_v16, 0.0 }
   0x8   :  { %v58_v30 = vrot.slane %v57_v29, 4  ;;  %v64_v31 = vsel %vm35_vm1, %v31_v17, 0.0  ;;  %v71_v32 = vsel %vm35_vm1, %v32_v18, 0.0  ;;  %v78_v33 = vsel %vm35_vm1, %v33_v19, 0.0 }
   0x9   :  { %v38_v34 = vadd.f32 %v37_v26, %v36_v22  ;;  %v45_v35 = vadd.f32 %v44_v27, %v43_v23  ;;  %v52_v36 = vadd.f32 %v51_v28, %v50_v24  ;;  %v65_v37 = vrot.slane %v64_v31, 4 }
   0xa   :  { %v59_v38 = vadd.f32 %v58_v30, %v57_v29  ;;  %v72_v39 = vrot.slane %v71_v32, 4  ;;  %v79_v40 = vrot.slane %v78_v33, 4  ;;  %v85_v41 = vsel %vm35_vm1, %v34_v20, 0.0 }
   0xb   :  { %189 = vmatpush.bf16.msra.mxu1 %v219_v25  ;;  %v39_v42 = vrot.slane %v38_v34, 2  ;;  %v46_v43 = vrot.slane %v45_v35, 2  ;;  %v53_v44 = vrot.slane %v52_v36, 2  ;;  %v66_v45 = vadd.f32 %v65_v37, %v64_v31 }
   0xc   :  { %v60_v46 = vrot.slane %v59_v38, 2  ;;  %v73_v47 = vadd.f32 %v72_v39, %v71_v32  ;;  %v80_v48 = vadd.f32 %v79_v40, %v78_v33  ;;  %v86_v49 = vrot.slane %v85_v41, 4  ;;  %v113_v39 = vld [vmem:[%s331_s3] sm:$0xf]  ;;  %s203_s3 = sshll.u32 %s332_s4, 4  ;;  %s204_s3 = int_to_ptr.hbm [resolvable:$true] %s203_s3 }
   0xd   :  { %v40_v50 = vadd.f32 %v39_v42, %v38_v34  ;;  %v47_v51 = vadd.f32 %v46_v43, %v45_v35  ;;  %v54_v52 = vadd.f32 %v53_v44, %v52_v36  ;;  %v67_v53 = vrot.slane %v66_v45, 2 }
   0xe   :  { %v61_v54 = vadd.f32 %v60_v46, %v59_v38  ;;  %v74_v55 = vrot.slane %v73_v47, 2  ;;  %v81_v56 = vrot.slane %v80_v48, 2  ;;  %v87_v57 = vadd.f32 %v86_v49, %v85_v41 }
   0xf   :  { %v41_v58 = vrot.slane %v40_v50, 1  ;;  %v48_v59 = vrot.slane %v47_v51, 1  ;;  %v55_v60 = vrot.slane %v54_v52, 1  ;;  %v68_v61 = vadd.f32 %v67_v53, %v66_v45 }
  0x10   :  { %v62_v62 = vrot.slane %v61_v54, 1  ;;  %v75_v63 = vadd.f32 %v74_v55, %v73_v47  ;;  %v82_v0 = vadd.f32 %v81_v56, %v80_v48  ;;  %v88_v1 = vrot.slane %v87_v57, 2 }
  0x11   :  { %v42_v2 = vadd.f32 %v41_v58, %v40_v50  ;;  %v49_v3 = vadd.f32 %v48_v59, %v47_v51  ;;  %v56_v4 = vadd.f32 %v55_v60, %v54_v52  ;;  %v69_v5 = vrot.slane %v68_v61, 1 }
  0x12   :  { %v63_v6 = vadd.f32 %v62_v62, %v61_v54  ;;  %v76_v7 = vrot.slane %v75_v63, 1  ;;  %v83_v8 = vrot.slane %v82_v0, 1  ;;  %v89_v9 = vadd.f32 %v88_v1, %v87_v57 }
  0x13   :  { %v70_v10 = vadd.f32 %v69_v5, %v68_v61  ;;  %v92_v11 = vpack.c.bf16 %v42_v2, %v42_v2  ;;  %v93_v12 = vpack.c.bf16 %v49_v3, %v49_v3  ;;  %v94_v13 = vpack.c.bf16 %v56_v4, %v56_v4 }
  0x14   :  { %v77_v14 = vadd.f32 %v76_v7, %v75_v63  ;;  %v84_v15 = vadd.f32 %v83_v8, %v82_v0  ;;  %v90_v16 = vrot.slane %v89_v9, 1  ;;  %v95_v17 = vpack.c.bf16 %v63_v6, %v63_v6 }
  0x15   :  { %v96_v18 = vpack.c.bf16 %v70_v10, %v70_v10  ;;  %v143_v19 = vunpack.c.l.b16 %v92_v11  ;;  %v144_v20 = vunpack.c.l.b16 %v93_v12  ;;  %v145_v21 = vunpack.c.l.b16 %v94_v13 }
  0x16   :  { %v91_v22 = vadd.f32 %v90_v16, %v89_v9  ;;  %v97_v23 = vpack.c.bf16 %v77_v14, %v77_v14  ;;  %v98_v24 = vpack.c.bf16 %v84_v15, %v84_v15  ;;  %v146_v25 = vunpack.c.l.b16 %v95_v17 }
  0x17   :  { %v147_v26 = vunpack.c.l.b16 %v96_v18  ;;  %v152_v27 = vsel %vm151_vm2, %v144_v20, %v143_v19  ;;  %vm153_vm3 = vcmask 1042434   ;;  %vm155_vm4 = vcmask 1043459  }
  0x18   :  { %v99_v28 = vpack.c.bf16 %v91_v22, %v91_v22  ;;  %v148_v29 = vunpack.c.l.b16 %v97_v23  ;;  %v149_v30 = vunpack.c.l.b16 %v98_v24  ;;  %v154_v31 = vsel %vm153_vm3, %v145_v21, %v152_v27 }
  0x19   :  { %v156_v32 = vsel %vm155_vm4, %v146_v25, %v154_v31  ;;  %vm157_vm5 = vcmask 1044484   ;;  %vm159_vm6 = vcmask 1045509   ;;  %vm161_vm7 = vcmask 1046534  }
  0x1a   :  { %v150_v33 = vunpack.c.l.b16 %v99_v28  ;;  %v158_v34 = vsel %vm157_vm5, %v147_v26, %v156_v32  ;;  %vm163_vm8 = vcmask 1047559   ;;  %vm175_vm9 = vcmask 195584  }
  0x1b   :  { %v160_v35 = vsel %vm159_vm6, %v148_v29, %v158_v34  ;;  %v120_v40 = vsel %vm118_vm0, %v113_v39, 0  ;;  %v101_v41 = vlaneseq  ;;  %v251_v44 = vmov 0.0  }
  0x1c   :  { %v162_v36 = vsel %vm161_vm7, %v149_v30, %v160_v35  ;;  %129 = vmatpush.bf16.msra.mxu0 %v120_v40  ;;  %vm114_vm11 = vcmask 64512  }
  0x1d   :  { %v164_v37 = vsel %vm163_vm8, %v150_v33, %v162_v36  ;;  %v102_v42 = vand.u32 127, %v101_v41 }
  0x1e   :  { %v165_v38 = vpack.c.b16 %v164_v37, %v164_v37 }
  0x20   :  { %218 = vmatmul.msk.bf16.vlgmr.msra.gmra.mxu1 %vm175_vm9, %v165_v38 }
  0x74   :  { %v105_v43 = vpop.permute.xlu0 %104 }
  0x75   :  { %vm106_vm10 = vcmp.eq.s32.totalorder %v102_v42, %v105_v43 }
  0x76   :  { %v212_v45 = vsel %vm106_vm10, 1.0, %v251_v44 }
  0x77   :  { %v109_v46 = vpack.c.bf16 %v212_v45, %v212_v45 }
  0x79   :  { %213 = vmatmul.msk.bf16.vlgmr.msra.gmra.mxu0 %vm114_vm11, %v109_v46 }
  0x9d   :  { %v191_v47 = vpop.f32.mrf.mxu1 }
  0xa5   :  { %v193_v48 = vpop.f32.mrf.mxu1 }
  0xf6   :  { %v131_v49 = vpop.f32.mrf.mxu0 }
  0xf7   :  { %v192_v50 = vadd.f32 %v191_v47, %v131_v49 }
  0xf9   :  { %195 = vst [vmem:[#allocation2] sm:$0xff] %v192_v50 }
  0xfa   :  { %206 = dma.vmem_to_hbm [thread:$0]  %s202_s11, 128, %s204_s3, [#allocation3]  }
  0xfe   :  { %v133_v51 = vpop.f32.mrf.mxu0 }
  0xff   :  { %248 = dma.done.wait [#allocation3], 128  }
 0x100   :  { %249 = vsyncadd [#allocation3], 4294967168 }
 0x101   :  { %211 = vsyncpa [#allocation3], 1 }

</bundles_post_ra>
